<compile_context>
chip_gen: v7x
topology: tpu7x:2x2x1
jax: 0.10.0
libtpu: 0.0.40
codegen_flags: <defaults>
</compile_context>

<pallas_src>
from functools import partial

import jax
import jax.numpy as jnp
from jax.experimental import pallas as pl
from jax.experimental.pallas import tpu as pltpu


# Total in-flight VMEM target used for tile sizing (double-buffered in + out
# blocks plus ~3 tile-sized f32 intermediates), and the explicit scoped-VMEM
# limit passed to Mosaic.  48 MiB fits v7x (64 MiB physical) and is well under
# v5e/v6e's 128 MiB physical VMEM.
_VMEM_TARGET_BYTES = 40 * 1024 * 1024
_VMEM_LIMIT_BYTES = 48 * 1024 * 1024


def _sublane_multiple(dtype) -> int:
    itemsize = jnp.dtype(dtype).itemsize
    return {4: 8, 2: 16, 1: 32}.get(itemsize, 8)


def _layernorm_kernel(x_ref, g_ref, b_ref, o_ref, *, eps):
    # x_ref: (tile_n, d); g_ref/b_ref: (1, d) broadcast over rows.
    x = x_ref[...].astype(jnp.float32)
    d = x.shape[-1]
    inv_d = jnp.float32(1.0 / d)

    # Single fused pass: sum and sum-of-squares together (f32 accumulation).
    s = jnp.sum(x, axis=-1, keepdims=True)
    ss = jnp.sum(x * x, axis=-1, keepdims=True)
    mean = s * inv_d
    var = ss * inv_d - mean * mean
    var = jnp.maximum(var, 0.0)  # guard tiny negative from cancellation

    inv_std = jax.lax.rsqrt(var + jnp.float32(eps))
    g = g_ref[...].astype(jnp.float32)
    b = b_ref[...].astype(jnp.float32)
    y = (x - mean) * inv_std * g + b
    o_ref[...] = y.astype(o_ref.dtype)


def _pick_tile_n(n: int, sub: int, rows_budget: int):
    """Pick a row-tile size.

    Returns (tile_n, pad_rows).  Prefers tiles that (a) divide n exactly (no
    padding, no output slice), (b) are multiples of the sublane packing `sub`,
    (c) fit the VMEM-derived rows budget, and (d) leave >= 2 grid steps so
    v7x's two TensorCores both get work.
    """
    if n % sub == 0:
        divisors = [t for t in range(sub, n + 1, sub) if n % t == 0]
        fitting = [t for t in divisors if t <= rows_budget]
        if fitting:
            multi = [t for t in fitting if n // t >= 2]
            return (max(multi) if multi else max(fitting)), 0
        # Even the smallest aligned tile exceeds the budget (very large D):
        # take it and let the explicit vmem_limit absorb it.
        # TODO(synk): for D so large that an 8-row block exceeds VMEM, add a
        # second "arbitrary" grid axis over D with per-row accumulators.
        return sub, 0
    # n is not sublane-aligned: a full-dim block is always a legal block extent.
    if n <= rows_budget:
        return n, 0
    # Rare path: misaligned n that also doesn't fit a single block -> pad rows.
    tile = max(sub, (min(rows_budget, n) // sub) * sub)
    n_pad = pl.cdiv(n, tile) * tile
    return tile, n_pad - n


def layernorm_nchw(x: jax.Array, gamma: jax.Array, beta: jax.Array,
                   *, eps: float = 1e-5) -> jax.Array:
    """LayerNorm over all non-batch dims of x (matches nn.LayerNorm([C,H,W]))."""
    orig_shape = x.shape
    n = int(orig_shape[0])
    d = 1
    for s in orig_shape[1:]:
        d *= int(s)

    # Free reshapes (dimension collapse, no HBM data movement).
    x2 = x.reshape(n, d)
    g2 = gamma.reshape(1, d)
    b2 = beta.reshape(1, d)

    in_item = jnp.dtype(x.dtype).itemsize
    out_item = in_item
    # Per-row in-flight bytes: double-buffered input + output blocks plus
    # roughly 3 tile-sized f32 intermediates (x upcast, x*x, y).
    per_row_bytes = d * (2 * in_item + 2 * out_item + 3 * 4)
    rows_budget = max(1, _VMEM_TARGET_BYTES // per_row_bytes)

    sub = _sublane_multiple(x.dtype)
    tile_n, pad_rows = _pick_tile_n(n, sub, rows_budget)
    n_run = n + pad_rows
    if pad_rows:
        # Rare fallback only (misaligned N that also exceeds one block).
        x2 = jnp.pad(x2, ((0, pad_rows), (0, 0)))

    # Explicit scoped-VMEM limit with headroom for the chosen block size.
    needed = (tile_n * d * (2 * in_item + 2 * out_item + 3 * 4)
              + 4 * d * (jnp.dtype(gamma.dtype).itemsize
                         + jnp.dtype(beta.dtype).itemsize)
              + (2 << 20))
    vmem_limit = int(max(_VMEM_LIMIT_BYTES, needed))

    kernel = partial(_layernorm_kernel, eps=eps)
    grid = (n_run // tile_n,)

    out = pl.pallas_call(
        kernel,
        out_shape=jax.ShapeDtypeStruct((n_run, d), x.dtype),
        grid_spec=pl.GridSpec(
            grid=grid,
            in_specs=[
                pl.BlockSpec((tile_n, d), lambda i: (i, 0)),
                pl.BlockSpec((1, d), lambda i: (0, 0)),
                pl.BlockSpec((1, d), lambda i: (0, 0)),
            ],
            out_specs=pl.BlockSpec((tile_n, d), lambda i: (i, 0)),
        ),
        compiler_params=pltpu.CompilerParams(
            dimension_semantics=("parallel",),
            vmem_limit_bytes=vmem_limit,
        ),
    )(x2, g2, b2)

    if pad_rows:
        out = out[:n, :]
    return out.reshape(orig_shape)


def _layernorm_ref(x, gamma, beta, eps=1e-5):
    n = x.shape[0]
    xr = x.reshape(n, -1).astype(jnp.float32)
    mean = xr.mean(axis=-1, keepdims=True)
    var = ((xr - mean) ** 2).mean(axis=-1, keepdims=True)
    y = (xr - mean) * jax.lax.rsqrt(var + jnp.float32(eps))
    y = y.reshape(x.shape) * gamma.astype(jnp.float32) + beta.astype(jnp.float32)
    return y.astype(x.dtype)


if __name__ == "__main__":
    key = jax.random.PRNGKey(0)
    k_x, k_g, k_b, k_x2 = jax.random.split(key, 4)

    # Input shape implied by the module: (batch, batch_dim, size, size).
    N, C, H, W = 2, 4, 16, 16
    x = jax.random.normal(k_x, (N, C, H, W), dtype=jnp.float32)

    # nn.LayerNorm default init is weight=1, bias=0; perturb to exercise affine.
    gamma = jnp.ones((C, H, W), jnp.float32) + 0.1 * jax.random.normal(k_g, (C, H, W))
    beta = 0.1 * jax.random.normal(k_b, (C, H, W), dtype=jnp.float32)

    y = layernorm_nchw(x, gamma, beta, eps=1e-5)
    jax.block_until_ready(y)
    ref = _layernorm_ref(x, gamma, beta, eps=1e-5)
    assert y.shape == ref.shape and y.dtype == ref.dtype
    assert jnp.allclose(y, ref, atol=1e-4, rtol=1e-4), "mismatch vs reference"

    # Default parameters (weight=1, bias=0).
    ones = jnp.ones((C, H, W), jnp.float32)
    zeros = jnp.zeros((C, H, W), jnp.float32)
    y_default = layernorm_nchw(x, ones, zeros)
    ref_default = _layernorm_ref(x, ones, zeros)
    assert jnp.allclose(y_default, ref_default, atol=1e-4, rtol=1e-4)

    # Larger batch exercises the multi-tile (>= 2 grid steps) path.
    N2 = 32
    x_big = jax.random.normal(k_x2, (N2, C, H, W), dtype=jnp.float32)
    y_big = layernorm_nchw(x_big, gamma, beta, eps=1e-5)
    jax.block_until_ready(y_big)
    ref_big = _layernorm_ref(x_big, gamma, beta, eps=1e-5)
    assert jnp.allclose(y_big, ref_big, atol=1e-4, rtol=1e-4)

    print("KERNEL_OK")
</pallas_src>

<mosaic_0001>
module attributes {stable_mosaic.version = 11 : i64} {
  func.func @_layernorm_kernel(%arg0: i32, %arg1: memref<2x1024xf32, #tpu.memory_space<vmem>>, %arg2: memref<1x1024xf32, #tpu.memory_space<vmem>>, %arg3: memref<1x1024xf32, #tpu.memory_space<vmem>>, %arg4: memref<2x1024xf32, #tpu.memory_space<vmem>>) attributes {dimension_semantics = [#tpu.dimension_semantics<parallel>], iteration_bounds = array<i64: 1>, scalar_prefetch = 0 : i64, scratch_operands = 0 : i64, tpu.core_type = #tpu.core_type<tc>, window_params = [{transform_indices = @transform_0, window_bounds = array<i64: 2, 1024>}, {pipeline_mode = #tpu.pipeline_mode<synchronous>, transform_indices = @transform_1, window_bounds = array<i64: 1, 1024>}, {pipeline_mode = #tpu.pipeline_mode<synchronous>, transform_indices = @transform_2, window_bounds = array<i64: 1, 1024>}, {transform_indices = @transform_3, window_bounds = array<i64: 2, 1024>}]} {
    %c0 = arith.constant 0 : index
    %c0_0 = arith.constant 0 : index
    %0 = vector.load %arg1[%c0, %c0_0] : memref<2x1024xf32, #tpu.memory_space<vmem>>, vector<2x1024xf32>
    %cst = arith.constant dense<0.000000e+00> : vector<2xf32>
    %1 = vector.multi_reduction <add>, %0, %cst [1] : vector<2x1024xf32> to vector<2xf32>
    %2 = vector.shape_cast %1 : vector<2xf32> to vector<2x1xf32>
    %3 = arith.mulf %0, %0 : vector<2x1024xf32>
    %cst_1 = arith.constant dense<0.000000e+00> : vector<2xf32>
    %4 = vector.multi_reduction <add>, %3, %cst_1 [1] : vector<2x1024xf32> to vector<2xf32>
    %5 = vector.shape_cast %4 : vector<2xf32> to vector<2x1xf32>
    %cst_2 = arith.constant 9.765625E-4 : f32
    %6 = vector.broadcast %cst_2 : f32 to vector<2x1xf32>
    %7 = arith.mulf %2, %6 : vector<2x1xf32>
    %cst_3 = arith.constant 9.765625E-4 : f32
    %8 = vector.broadcast %cst_3 : f32 to vector<2x1xf32>
    %9 = arith.mulf %5, %8 : vector<2x1xf32>
    %10 = arith.mulf %7, %7 : vector<2x1xf32>
    %11 = arith.subf %9, %10 : vector<2x1xf32>
    %cst_4 = arith.constant 0.000000e+00 : f32
    %12 = vector.broadcast %cst_4 : f32 to vector<2x1xf32>
    %13 = arith.maximumf %11, %12 : vector<2x1xf32>
    %cst_5 = arith.constant 9.99999974E-6 : f32
    %14 = vector.broadcast %cst_5 : f32 to vector<2x1xf32>
    %15 = arith.addf %13, %14 : vector<2x1xf32>
    %16 = math.rsqrt %15 : vector<2x1xf32>
    %c0_6 = arith.constant 0 : index
    %c0_7 = arith.constant 0 : index
    %17 = vector.load %arg2[%c0_6, %c0_7] : memref<1x1024xf32, #tpu.memory_space<vmem>>, vector<1x1024xf32>
    %c0_8 = arith.constant 0 : index
    %c0_9 = arith.constant 0 : index
    %18 = vector.load %arg3[%c0_8, %c0_9] : memref<1x1024xf32, #tpu.memory_space<vmem>>, vector<1x1024xf32>
    %19 = vector.broadcast %7 : vector<2x1xf32> to vector<2x1024xf32>
    %20 = arith.subf %0, %19 : vector<2x1024xf32>
    %21 = vector.broadcast %16 : vector<2x1xf32> to vector<2x1024xf32>
    %22 = arith.mulf %20, %21 : vector<2x1024xf32>
    %23 = vector.broadcast %17 : vector<1x1024xf32> to vector<2x1024xf32>
    %24 = arith.mulf %22, %23 : vector<2x1024xf32>
    %25 = vector.broadcast %18 : vector<1x1024xf32> to vector<2x1024xf32>
    %26 = arith.addf %24, %25 : vector<2x1024xf32>
    %c0_10 = arith.constant 0 : index
    %c0_11 = arith.constant 0 : index
    %27 = vector.load %arg4[%c0_10, %c0_11] : memref<2x1024xf32, #tpu.memory_space<vmem>>, vector<2x1024xf32>
    tpu.vector_store %arg4[%c0_10, %c0_11], %26 {strides = array<i32>} : memref<2x1024xf32, #tpu.memory_space<vmem>>, vector<2x1024xf32>,
    return
  }
  func.func @transform_0(%arg0: i32) -> (i32, i32) {
    %c0_i32 = arith.constant 0 : i32
    %c0_i32_0 = arith.constant 0 : i32
    return %arg0, %c0_i32 : i32, i32
  }
  func.func @transform_1(%arg0: i32) -> (i32, i32) {
    %c0_i32 = arith.constant 0 : i32
    %c0_i32_0 = arith.constant 0 : i32
    %c0_i32_1 = arith.constant 0 : i32
    return %c0_i32, %c0_i32_0 : i32, i32
  }
  func.func @transform_2(%arg0: i32) -> (i32, i32) {
    %c0_i32 = arith.constant 0 : i32
    %c0_i32_0 = arith.constant 0 : i32
    %c0_i32_1 = arith.constant 0 : i32
    return %c0_i32, %c0_i32_0 : i32, i32
  }
  func.func @transform_3(%arg0: i32) -> (i32, i32) {
    %c0_i32 = arith.constant 0 : i32
    %c0_i32_0 = arith.constant 0 : i32
    return %arg0, %c0_i32 : i32, i32
  }
}

</mosaic_0001>

<bundles_post_ra>
// kernel: tpu_custom_call.1
= control target key start
LH: loop header
LB: loop body
LE: loop exit
PB: predicated region body
PF: predicated region fallthrough
CT: control target
= control target key end

     0   :  { %8 = vsyncpa [#allocation3], 0  ;;  %s608_s0 = inlined_call_operand.hbm [shape: f32[2,1024], index: 0, kind: input, shape index: {}]   ;;  %s609_s1 = inlined_call_operand.hbm [shape: f32[1,1024], index: 1, kind: input, shape index: {}]   ;;  %s610_s2 = inlined_call_operand.hbm [shape: f32[1,1024], index: 2, kind: input, shape index: {}]   ;;  %s611_s3 = inlined_call_operand.hbm [shape: f32[2,1024], index: 3, kind: output, shape index: {}]  }
   0x1   :  { %9 = vsyncpa [#allocation6], 0 }
   0x2   :  { %10 = vsyncpa [#allocation4], 0  ;;  %s472_s12 = smov [#allocation5]   ;;  %s473_s14 = smov [#allocation2]  }
   0x3   :  { %s27_s13 = sshll.u32 %s472_s12, 4  ;;  %s17_s15 = sshll.u32 %s473_s14, 4  ;;  %s28_s13 = int_to_ptr.vmem [resolvable:$true] %s27_s13  ;;  %s18_s15 = int_to_ptr.vmem [resolvable:$true] %s17_s15 }
   0x4   :  { %s378_s18 = scalar_lea.hbm %s609_s1, 128 }
   0x5   :  { %p379_p0 = scmp.ne.s32.totalorder %s609_s1, %s378_s18  ;;  %p382_p1 = scmp.lt.u32.totalorder %s378_s18, %s609_s1 }
   0x7   :  { %p384_p2 = pnand %p382_p1, %p379_p0 }
   0x9   :  { %387 = shalt.err (!%p384_p2)
}
   0xa   :  { %s388_s23 = scalar_lea.vmem %s28_s13, 128  ;;  %p393_p4 = scmp.lt.s32.totalorder %s28_s13, %s28_s13 }
   0xb   :  { %p389_p3 = scmp.ne.s32.totalorder %s28_s13, %s388_s23  ;;  %p394_p5 = scmp.lt.s32.totalorder %s388_s23, %s388_s23 }
   0xd   :  { %p395_p6 = por %p394_p5, %p393_p4 }
   0xf   :  { %p396_p7 = pnand %p395_p6, %p389_p3 }
  0x11   :  { %399 = shalt.err (!%p396_p7)
}
  0x12   :  { %30 = dma.hbm_to_vmem [thread:$0]  %s609_s1, 128, %s28_s13, [#allocation6]  }
  0x13   :  { %s400_s28 = scalar_lea.hbm %s608_s0, 256 }
  0x14   :  { %p401_p8 = scmp.ne.s32.totalorder %s608_s0, %s400_s28  ;;  %p404_p9 = scmp.lt.u32.totalorder %s400_s28, %s608_s0 }
  0x16   :  { %p406_p10 = pnand %p404_p9, %p401_p8 }
  0x18   :  { %409 = shalt.err (!%p406_p10)
}
  0x19   :  { %s410_s6 = scalar_lea.vmem %s18_s15, 256  ;;  %p415_p12 = scmp.lt.s32.totalorder %s18_s15, %s18_s15 }
  0x1a   :  { %p411_p11 = scmp.ne.s32.totalorder %s18_s15, %s410_s6  ;;  %p416_p13 = scmp.lt.s32.totalorder %s410_s6, %s410_s6 }
  0x1c   :  { %p417_p0 = por %p416_p13, %p415_p12 }
  0x1e   :  { %p418_p1 = pnand %p417_p0, %p411_p11 }
  0x20   :  { %421 = shalt.err (!%p418_p1)
}
  0x21   :  { %20 = dma.hbm_to_vmem [thread:$0]  %s608_s0, 256, %s18_s15, [#allocation3]  }
  0x22   :  { %s474_s8 = smov [#allocation7]   ;;  %s422_s12 = scalar_lea.hbm %s610_s2, 128 }
  0x23   :  { %s37_s9 = sshll.u32 %s474_s8, 4  ;;  %p423_p2 = scmp.ne.s32.totalorder %s610_s2, %s422_s12  ;;  %s38_s9 = int_to_ptr.vmem [resolvable:$true] %s37_s9 }
  0x24   :  { %p426_p3 = scmp.lt.u32.totalorder %s422_s12, %s610_s2 }
  0x26   :  { %p428_p4 = pnand %p426_p3, %p423_p2 }
  0x28   :  { %431 = shalt.err (!%p428_p4)
}
  0x29   :  { %s432_s18 = scalar_lea.vmem %s38_s9, 128  ;;  %p437_p6 = scmp.lt.s32.totalorder %s38_s9, %s38_s9 }
  0x2a   :  { %p433_p5 = scmp.ne.s32.totalorder %s38_s9, %s432_s18  ;;  %p438_p7 = scmp.lt.s32.totalorder %s432_s18, %s432_s18 }
  0x2c   :  { %p439_p8 = por %p438_p7, %p437_p6 }
  0x2e   :  { %p440_p9 = pnand %p439_p8, %p433_p5 }
  0x30   :  { %443 = shalt.err (!%p440_p9)
}
  0x31   :  { %40 = dma.hbm_to_vmem [thread:$0]  %s610_s2, 128, %s38_s9, [#allocation6]  }
  0x32   :  { %466 = dma.done.wait [#allocation3], 256  }
  0x33   :  { %467 = vsyncadd [#allocation3], 4294967040 }
  0x34   :  { %468 = dma.done.wait [#allocation6], 256  }
  0x35   :  { %469 = vsyncadd [#allocation6], 4294967040  ;;  %v58_v0 = vlaneseq  ;;  %v475_v1 = vmov 1983009808   ;;  %v539_v6 = vld [vmem:[#allocation2] sm:$0xff]  ;;  %v541_v7 = vld [vmem:[#allocation2 + $0x8] sm:$0xff] }
  0x36   :  { %v56_v2 = vunpack.c.l.s4 %v475_v1  ;;  %v54_v8 = vcombine.high %v539_v6, %v539_v6  ;;  %vm96_vm0 = vcmask 1041408   ;;  %v71_v10 = vcombine.high %v541_v7, %v541_v7  ;;  %v184_v60 = vld [vmem:[#allocation5] sm:$0xff]  ;;  %v185_v1 = vld [vmem:[#allocation7] sm:$0xff]  ;;  %s477_s2 = smov [#allocation8]  }
  0x37   :  { %v534_v3 = vshrl.u32 %v58_v0, 7  ;;  %v114_v11 = vmul.f32 %v539_v6, %v539_v6  ;;  %v115_v16 = vmul.f32 %v541_v7, %v541_v7  ;;  %s358_s19 = sshll.u32 %s477_s2, 4  ;;  %s359_s19 = int_to_ptr.vmem [resolvable:$true] %s358_s19 }
  0x38   :  { %v57_v4 = vunpack.c.0.s8 %v56_v2  ;;  %s444_s20 = scalar_lea.vmem %s359_s19, 256  ;;  %p449_p11 = scmp.lt.s32.totalorder %s359_s19, %s359_s19 }
  0x39   :  { %v118_v17 = vcombine.high %v114_v11, %v114_v11  ;;  %v135_v28 = vcombine.high %v115_v16, %v115_v16  ;;  %v211_v61 = vsub.s32 0, %v534_v3  ;;  %v215_v62 = vsub.s32 1, %v534_v3  ;;  %p445_p10 = scmp.ne.s32.totalorder %s359_s19, %s444_s20  ;;  %p450_p12 = scmp.lt.s32.totalorder %s444_s20, %s444_s20 }
  0x3a   :  { %v537_v5 = vsub.s32 %v57_v4, %v534_v3  ;;  %v219_v63 = vsub.s32 2, %v534_v3  ;;  %v223_v0 = vsub.s32 3, %v534_v3  ;;  %v227_v2 = vsub.s32 4, %v534_v3 }
  0x3b   :  { %v231_v4 = vsub.s32 5, %v534_v3  ;;  %p451_p13 = por %p450_p12, %p449_p11 }
  0x3c   :  { %v61_v9 = vrot.slane %v539_v6, %v537_v5  ;;  %v68_v12 = vrot.slane %v54_v8, %v537_v5  ;;  %v78_v14 = vrot.slane %v541_v7, %v537_v5  ;;  %v125_v18 = vrot.slane %v114_v11, %v537_v5 }
  0x3d   :  { %v85_v22 = vrot.slane %v71_v10, %v537_v5  ;;  %v132_v24 = vrot.slane %v118_v17, %v537_v5  ;;  %v142_v31 = vrot.slane %v115_v16, %v537_v5  ;;  %v149_v40 = vrot.slane %v135_v28, %v537_v5  ;;  %p452_p0 = pnand %p451_p13, %p445_p10 }
  0x3e   :  { %v69_v13 = vcombine.high %v61_v9, %v61_v9  ;;  %v97_v15 = vsel %vm96_vm0, %v61_v9, 0.0  ;;  %v70_v19 = vcombine.high %v68_v12, %v68_v12  ;;  %v100_v21 = vsel %vm96_vm0, %v68_v12, 0.0 }
  0x3f   :  { %v86_v25 = vcombine.high %v78_v14, %v78_v14  ;;  %v133_v27 = vcombine.high %v125_v18, %v125_v18  ;;  %v134_v30 = vcombine.high %v132_v24, %v132_v24  ;;  %v160_v32 = vsel %vm96_vm0, %v125_v18, 0.0 }
  0x40   :  { %v98_v20 = vsel %vm96_vm0, %v69_v13, 0.0  ;;  %v102_v26 = vsel %vm96_vm0, %v70_v19, 0.0  ;;  %v104_v33 = vsel %vm96_vm0, %v78_v14, 0.0  ;;  %v163_v35 = vsel %vm96_vm0, %v132_v24, 0.0 }
  0x41   :  { %v99_v23 = vadd.f32 %v98_v20, %v97_v15  ;;  %v161_v34 = vsel %vm96_vm0, %v133_v27, 0.0  ;;  %v87_v36 = vcombine.high %v85_v22, %v85_v22  ;;  %v106_v39 = vsel %vm96_vm0, %v86_v25, 0.0 }
  0x42   :  { %v162_v38 = vadd.f32 %v161_v34, %v160_v32  ;;  %v150_v41 = vcombine.high %v142_v31, %v142_v31  ;;  %v165_v42 = vsel %vm96_vm0, %v134_v30, 0.0  ;;  %v108_v45 = vsel %vm96_vm0, %v85_v22, 0.0 }
  0x43   :  { %v101_v29 = vadd.f32 %v100_v21, %v99_v23  ;;  %v167_v46 = vsel %vm96_vm0, %v142_v31, 0.0  ;;  %v110_v49 = vsel %vm96_vm0, %v87_v36, 0.0  ;;  %v151_v50 = vcombine.high %v149_v40, %v149_v40 }
  0x44   :  { %v164_v44 = vadd.f32 %v163_v35, %v162_v38  ;;  %v169_v51 = vsel %vm96_vm0, %v150_v41, 0.0  ;;  %v171_v54 = vsel %vm96_vm0, %v149_v40, 0.0  ;;  %v235_v8 = vsub.s32 6, %v534_v3 }
  0x45   :  { %v103_v37 = vadd.f32 %v102_v26, %v101_v29  ;;  %v173_v57 = vsel %vm96_vm0, %v151_v50, 0.0  ;;  %v239_v9 = vsub.s32 7, %v534_v3  ;;  %v212_v10 = vrot.slane %v184_v60, %v211_v61 }
  0x46   :  { %v166_v48 = vadd.f32 %v165_v42, %v164_v44  ;;  %v216_v11 = vrot.slane %v184_v60, %v215_v62  ;;  %v220_v12 = vrot.slane %v184_v60, %v219_v63  ;;  %v224_v13 = vrot.slane %v184_v60, %v223_v0 }
  0x47   :  { %v105_v43 = vadd.f32 %v104_v33, %v103_v37  ;;  %v228_v14 = vrot.slane %v184_v60, %v227_v2  ;;  %v232_v15 = vrot.slane %v184_v60, %v231_v4  ;;  %v236_v16 = vrot.slane %v184_v60, %v235_v8 }
  0x48   :  { %v168_v53 = vadd.f32 %v167_v46, %v166_v48  ;;  %v240_v17 = vrot.slane %v184_v60, %v239_v9  ;;  %v241_v18 = vcombine.low %v212_v10, %v216_v11  ;;  %v242_v19 = vcombine.low %v220_v12, %v224_v13 }
  0x49   :  { %v107_v47 = vadd.f32 %v106_v39, %v105_v43  ;;  %v283_v20 = vrot.slane %v185_v1, %v211_v61  ;;  %v287_v21 = vrot.slane %v185_v1, %v215_v62  ;;  %v258_v22 = vcombine.low %v228_v14, %v232_v15 }
  0x4a   :  { %v170_v56 = vadd.f32 %v169_v51, %v168_v53  ;;  %v259_v23 = vcombine.low %v236_v16, %v240_v17  ;;  %v291_v24 = vrot.slane %v185_v1, %v219_v63  ;;  %v295_v25 = vrot.slane %v185_v1, %v223_v0 }
  0x4b   :  { %v109_v52 = vadd.f32 %v108_v45, %v107_v47  ;;  %v249_v26 = vrot.slane %v241_v18, %v537_v5  ;;  %v256_v27 = vrot.slane %v242_v19, %v537_v5  ;;  %v299_v28 = vrot.slane %v185_v1, %v227_v2 }
  0x4c   :  { %v172_v58 = vadd.f32 %v171_v54, %v170_v56  ;;  %v303_v29 = vrot.slane %v185_v1, %v231_v4  ;;  %v266_v30 = vrot.slane %v258_v22, %v537_v5  ;;  %v273_v31 = vrot.slane %v259_v23, %v537_v5 }
  0x4d   :  { %v111_v55 = vadd.f32 %v110_v49, %v109_v52  ;;  %v307_v32 = vrot.slane %v185_v1, %v235_v8  ;;  %v311_v33 = vrot.slane %v185_v1, %v239_v9  ;;  %v257_v34 = vcombine.low %v249_v26, %v256_v27 }
  0x4e   :  { %v174_v59 = vadd.f32 %v173_v57, %v172_v58  ;;  %v312_v35 = vcombine.low %v283_v20, %v287_v21  ;;  %v313_v36 = vcombine.low %v291_v24, %v295_v25  ;;  %v329_v37 = vcombine.low %v299_v28, %v303_v29 }
  0x4f   :  { %112 = vadd.xlane.f32.xlu0 %v111_v55  ;;  %v274_v38 = vcombine.low %v266_v30, %v273_v31  ;;  %v330_v39 = vcombine.low %v307_v32, %v311_v33  ;;  %v476_v52 = vmov 269488144  }
  0x50   :  { %v320_v40 = vrot.slane %v312_v35, %v537_v5  ;;  %v327_v41 = vrot.slane %v313_v36, %v537_v5  ;;  %v337_v42 = vrot.slane %v329_v37, %v537_v5  ;;  %v188_v53 = vunpack.c.l.s4 %v476_v52 }
  0x51   :  { %v344_v43 = vrot.slane %v330_v39, %v537_v5 }
  0x52   :  { %v328_v44 = vcombine.low %v320_v40, %v327_v41  ;;  %v189_v56 = vunpack.c.0.s8 %v188_v53 }
  0x53   :  { %175 = vadd.xlane.f32.xlu0 %v174_v59  ;;  %v345_v45 = vcombine.low %v337_v42, %v344_v43 }
  0x54   :  { %v192_v57 = vsub.s32 %v189_v56, %v534_v3 }
  0xdc   :  { %v113_v46 = vpop.xlane.xlu0 %112 }
  0xdd   :  { %v177_v47 = vmul.f32 0.0009765625, %v113_v46 }
  0xdf   :  { %v179_v49 = vmul.f32 %v177_v47, %v177_v47  ;;  %v193_v58 = vrot.slane %v177_v47, %v192_v57 }
  0xe0   :  { %v176_v48 = vpop.xlane.xlu0 %175 }
  0xe1   :  { %v178_v50 = vmul.f32 0.0009765625, %v176_v48  ;;  %v195_v5 = vsub.f32 %v539_v6, %v193_v58  ;;  %v196_v60 = vsub.f32 %v541_v7, %v193_v58 }
  0xe3   :  { %v180_v51 = vsub.f32 %v178_v50, %v179_v49 }
  0xe5   :  { %v181_v54 = vmax.f32 %v180_v51, 0.0 }
  0xe7   :  { %v182_v55 = vadd.f32 1e-05, %v181_v54 }
  0xe9   :  { %376 = vrsqrt.f32 %v182_v55 }
  0xf3   :  { %v377_v59 = vpop.eup %376 }
  0xf4   :  { %v204_v61 = vrot.slane %v377_v59, %v192_v57 }
  0xf6   :  { %v206_v62 = vmul.f32 %v204_v61, %v195_v5  ;;  %v207_v63 = vmul.f32 %v204_v61, %v196_v60 }
  0xf8   :  { %v277_v0 = vmul.f32 %v257_v34, %v206_v62  ;;  %v278_v1 = vmul.f32 %v274_v38, %v207_v63 }
  0xfa   :  { %v348_v2 = vadd.f32 %v328_v44, %v277_v0  ;;  %v349_v4 = vadd.f32 %v345_v45, %v278_v1 }
  0xfc   :  { %350 = vst [vmem:[#allocation8] sm:$0xff] %v348_v2  ;;  %351 = vst [vmem:[#allocation8 + $0x8] sm:$0xff] %v349_v4 }
  0xfd   :  { %455 = shalt.err (!%p452_p0)
}
  0xfe   :  { %s456_s23 = scalar_lea.hbm %s611_s3, 256 }
  0xff   :  { %p457_p1 = scmp.ne.s32.totalorder %s611_s3, %s456_s23  ;;  %p460_p2 = scmp.lt.u32.totalorder %s456_s23, %s611_s3 }
 0x101   :  { %p462_p3 = pnand %p460_p2, %p457_p1 }
 0x103   :  { %465 = shalt.err (!%p462_p3)
}
 0x104   :  { %361 = dma.vmem_to_hbm [thread:$0]  %s359_s19, 256, %s611_s3, [#allocation4]  }
 0x105   :  { %470 = dma.done.wait [#allocation4], 256  }
 0x106   :  { %471 = vsyncadd [#allocation4], 4294967040 }
 0x107   :  { %365 = vsyncpa [#allocation3], 1 }
 0x108   :  { %366 = vsyncpa [#allocation6], 1 }
 0x109   :  { %367 = vsyncpa [#allocation4], 1 }

</bundles_post_ra>
